<compile_context>
chip_gen: v7x
topology: tpu7x:2x2x1
jax: 0.10.0
libtpu: 0.0.40
codegen_flags: <defaults>
</compile_context>

<pallas_src>
import jax
import jax.numpy as jnp
from jax.experimental import pallas as pl
from jax.experimental.pallas import tpu as pltpu

# ----------------------------- config --------------------------------------
HIDDEN = 768          # BERT hidden size (fc_multiclass_1 input)
H1 = 128              # config['train']['classifier_net']['mc_linear_hidden_1']
H2 = 64               # config['train']['classifier_net']['mc_linear_hidden_2']
NUM_LABELS = 6        # len(config['marks']) + 1
C_PAD = 128           # lane-dense padded class dimension
IGNORE_INDEX = -100
NEG_INF = -1e30

CLASS_WEIGHTS = jnp.array(
    [0.7432966375816064, 0.02141450301537206, 0.16100701881706023,
     0.04058612682252735, 0.03277620324212341, 0.0009195105213105526],
    dtype=jnp.float32,
)


# ----------------------------- kernel --------------------------------------
def head_and_loss_kernel(h_ref, w1_ref, b1_ref, w2_ref, b2_ref, w3_ref, b3_ref,
                         lbl_ref, cw_ref, logits_ref, num_ref, den_ref):
    """One (TM, 768) token tile: 3x Linear + tanh head + per-row weighted-CE partials.

    h_ref:   (TM, 768) bf16     flattened last_hidden_state tile
    w1/w2/w3: bf16 weights (w3 zero-padded to (64, 128)); b1/b2/b3: f32 biases ((1, C_PAD) for b3)
    lbl_ref: (TM, 1) int32      labels, -100 = ignore
    cw_ref:  (1, C_PAD) f32     per-class loss weights (zero-padded)
    logits_ref: (TM, C_PAD) f32 lane-dense logits output
    num_ref/den_ref: (TM, 1) f32 per-row weighted NLL / per-row weight (reduced in wrapper)
    """
    # bf16 MXU matmuls with f32 accumulation; elementwise/EUP math in f32.
    z1 = jnp.tanh(
        jnp.dot(h_ref[...], w1_ref[...], preferred_element_type=jnp.float32)
        + b1_ref[...])
    z2 = jnp.tanh(
        jnp.dot(z1.astype(jnp.bfloat16), w2_ref[...],
                preferred_element_type=jnp.float32) + b2_ref[...])
    logits = jnp.dot(z2.astype(jnp.bfloat16), w3_ref[...],
                     preferred_element_type=jnp.float32) + b3_ref[...]   # (TM, 128)
    logits_ref[...] = logits

    # --- weighted cross entropy partials (ignore_index=-100) ---
    lbl = lbl_ref[...]                                                   # (TM, 1)
    cls_ids = jax.lax.broadcasted_iota(jnp.int32, logits.shape, 1)       # (TM, 128)
    onehot = (cls_ids == lbl).astype(jnp.float32)                        # padded lanes never match

    masked = jnp.where(cls_ids < NUM_LABELS, logits, NEG_INF)            # mask padded class lanes
    m = jnp.max(masked, axis=-1, keepdims=True)
    lse = m + jnp.log(jnp.sum(jnp.exp(masked - m), axis=-1, keepdims=True))   # (TM, 1)
    logit_y = jnp.sum(logits * onehot, axis=-1, keepdims=True)                # (TM, 1)
    nll = lse - logit_y

    row_valid = (lbl != IGNORE_INDEX).astype(jnp.float32)                # (TM, 1)
    w_y = jnp.sum(cw_ref[...] * onehot, axis=-1, keepdims=True)          # (TM, 1)
    w_eff = row_valid * w_y

    num_ref[...] = w_eff * nll
    den_ref[...] = w_eff


# ----------------------------- wrapper --------------------------------------
def _round_up(x, m):
    return (x + m - 1) // m * m


@jax.jit
def bert_finetune_forward(last_hidden_state, labels, params):
    """Mirrors BERTFinetune.forward after the frozen backbone.

    last_hidden_state: (B, S, 768) f32
    labels:            (B, S) int32 (-100 = ignore)
    returns (loss: scalar f32, logits: (B, S, NUM_LABELS) f32)
    """
    B, S, D = last_hidden_state.shape
    M = B * S
    TM = 512 if M >= 512 else _round_up(M, 8)
    M_pad = _round_up(M, TM)
    n_tiles = M_pad // TM

    # bf16 activations halve the dominant HBM traffic; pad tokens with ignored rows.
    h = last_hidden_state.reshape(M, D).astype(jnp.bfloat16)
    h = jnp.pad(h, ((0, M_pad - M), (0, 0)))
    lbl = labels.reshape(M, 1).astype(jnp.int32)
    lbl = jnp.pad(lbl, ((0, M_pad - M), (0, 0)), constant_values=IGNORE_INDEX)

    w1 = params["w1"].astype(jnp.bfloat16)
    b1 = params["b1"].astype(jnp.float32)
    w2 = params["w2"].astype(jnp.bfloat16)
    b2 = params["b2"].astype(jnp.float32)
    w3 = jnp.pad(params["w3"].astype(jnp.bfloat16),
                 ((0, 0), (0, C_PAD - NUM_LABELS)))
    b3 = jnp.pad(params["b3"].astype(jnp.float32),
                 ((0, 0), (0, C_PAD - NUM_LABELS)))
    cw = jnp.pad(CLASS_WEIGHTS.reshape(1, NUM_LABELS),
                 ((0, 0), (0, C_PAD - NUM_LABELS)))

    def const(shape):  # weight stays resident in VMEM across the whole grid
        return pl.BlockSpec(shape, lambda i: (0, 0))

    cost = pl.CostEstimate(
        flops=2 * M_pad * (HIDDEN * H1 + H1 * H2 + H2 * C_PAD),
        transcendentals=M_pad * (H1 + H2 + C_PAD + 1),
        bytes_accessed=(M_pad * (HIDDEN * 2 + 4 + C_PAD * 4 + 8)
                        + HIDDEN * H1 * 2 + H1 * H2 * 2 + H2 * C_PAD * 2),
    )

    logits_pad, num_rows, den_rows = pl.pallas_call(
        head_and_loss_kernel,
        out_shape=(
            jax.ShapeDtypeStruct((M_pad, C_PAD), jnp.float32),
            jax.ShapeDtypeStruct((M_pad, 1), jnp.float32),
            jax.ShapeDtypeStruct((M_pad, 1), jnp.float32),
        ),
        grid_spec=pltpu.PrefetchScalarGridSpec(
            num_scalar_prefetch=0,
            grid=(n_tiles,),
            in_specs=[
                pl.BlockSpec((TM, HIDDEN), lambda i: (i, 0)),   # h tile (pipelined)
                const((HIDDEN, H1)), const((1, H1)),            # fc1
                const((H1, H2)), const((1, H2)),                # fc2
                const((H2, C_PAD)), const((1, C_PAD)),          # fc_out (padded)
                pl.BlockSpec((TM, 1), lambda i: (i, 0)),        # labels tile
                const((1, C_PAD)),                              # class weights
            ],
            out_specs=(
                pl.BlockSpec((TM, C_PAD), lambda i: (i, 0)),    # lane-dense logits
                pl.BlockSpec((TM, 1), lambda i: (i, 0)),        # per-row weighted NLL
                pl.BlockSpec((TM, 1), lambda i: (i, 0)),        # per-row weight
            ),
        ),
        compiler_params=pltpu.CompilerParams(
            dimension_semantics=("parallel",),      # independent tiles -> v7x megacore
            vmem_limit_bytes=32 * 1024 * 1024,
        ),
        cost_estimate=cost,
    )(h, w1, b1, w2, b2, w3, b3, lbl, cw)

    num = jnp.sum(num_rows)
    den = jnp.sum(den_rows)
    # NOTE: if every label is IGNORE_INDEX this is 0/0 = NaN, matching torch's weighted CE.
    loss = num / den
    logits = logits_pad[:M, :NUM_LABELS].reshape(B, S, NUM_LABELS)
    return loss, logits


# ----------------------------- param init -----------------------------------
def init_params(key):
    """Deterministic init of the classifier head (PyTorch-Linear-like uniform)."""
    ks = jax.random.split(key, 6)

    def lin(kw, kb, fan_in, fan_out):
        bound = 1.0 / jnp.sqrt(fan_in)
        w = jax.random.uniform(kw, (fan_in, fan_out), jnp.float32, -bound, bound)
        b = jax.random.uniform(kb, (1, fan_out), jnp.float32, -bound, bound)
        return w, b

    w1, b1 = lin(ks[0], ks[1], HIDDEN, H1)
    w2, b2 = lin(ks[2], ks[3], H1, H2)
    w3, b3 = lin(ks[4], ks[5], H2, NUM_LABELS)
    return dict(w1=w1, b1=b1, w2=w2, b2=b2, w3=w3, b3=b3)


# ----------------------------- reference (plain JAX) -------------------------
def reference_forward(last_hidden_state, labels, params):
    """Same intended numerics as the kernel (bf16 matmuls, f32 accumulation/math)."""
    B, S, D = last_hidden_state.shape
    h = last_hidden_state.reshape(B * S, D).astype(jnp.bfloat16)
    z1 = jnp.tanh(
        jnp.dot(h, params["w1"].astype(jnp.bfloat16),
                preferred_element_type=jnp.float32) + params["b1"][0])
    z2 = jnp.tanh(
        jnp.dot(z1.astype(jnp.bfloat16), params["w2"].astype(jnp.bfloat16),
                preferred_element_type=jnp.float32) + params["b2"][0])
    logits = (jnp.dot(z2.astype(jnp.bfloat16), params["w3"].astype(jnp.bfloat16),
                      preferred_element_type=jnp.float32)
              + params["b3"][0]).reshape(B, S, NUM_LABELS)
    logp = jax.nn.log_softmax(logits, axis=-1)
    lbl_safe = jnp.where(labels == IGNORE_INDEX, 0, labels)
    nll = -jnp.take_along_axis(logp, lbl_safe[..., None], axis=-1)[..., 0]
    valid = (labels != IGNORE_INDEX).astype(jnp.float32)
    w_y = CLASS_WEIGHTS[lbl_safe] * valid
    loss = jnp.sum(w_y * nll) / jnp.sum(w_y)
    return loss, logits


# ----------------------------- main ------------------------------------------
if __name__ == "__main__":
    key = jax.random.PRNGKey(0)
    k_emb, k_ids, k_lbl, k_params = jax.random.split(key, 4)

    B, S, VOCAB = 2, 8, 100
    params = init_params(k_params)

    # TODO(synk): frozen pretrained BERT backbone not reproduced; a deterministic
    # embedding table stands in for model(input_ids, attention_mask).last_hidden_state.
    emb_table = jax.random.normal(k_emb, (VOCAB, HIDDEN), jnp.float32) * 0.02
    input_ids = jax.random.randint(k_ids, (B, S), 0, VOCAB, dtype=jnp.int32)
    attention_mask = jnp.ones((B, S), dtype=jnp.int32)
    last_hidden_state = emb_table[input_ids] * attention_mask[..., None]

    labels = jax.random.randint(k_lbl, (B, S), 0, NUM_LABELS, dtype=jnp.int32)
    labels = labels.at[0, 0].set(IGNORE_INDEX)  # exercise ignore_index path

    loss, logits = bert_finetune_forward(last_hidden_state, labels, params)
    jax.block_until_ready((loss, logits))

    ref_loss, ref_logits = reference_forward(last_hidden_state, labels, params)
    assert logits.shape == (B, S, NUM_LABELS)
    assert jnp.allclose(logits, ref_logits, rtol=1e-3, atol=1e-3)
    assert jnp.allclose(loss, ref_loss, rtol=1e-3, atol=1e-3)

    print("KERNEL_OK")
</pallas_src>

<mosaic_0001>
module attributes {stable_mosaic.version = 11 : i64} {
  func.func @head_and_loss_kernel(%arg0: i32, %arg1: memref<16x768xbf16, #tpu.memory_space<vmem>>, %arg2: memref<768x128xbf16, #tpu.memory_space<vmem>>, %arg3: memref<1x128xf32, #tpu.memory_space<vmem>>, %arg4: memref<128x64xbf16, #tpu.memory_space<vmem>>, %arg5: memref<1x64xf32, #tpu.memory_space<vmem>>, %arg6: memref<64x128xbf16, #tpu.memory_space<vmem>>, %arg7: memref<1x128xf32, #tpu.memory_space<vmem>>, %arg8: memref<16x1xi32, #tpu.memory_space<vmem>>, %arg9: memref<1x128xf32, #tpu.memory_space<vmem>>, %arg10: memref<16x128xf32, #tpu.memory_space<vmem>>, %arg11: memref<16x1xf32, #tpu.memory_space<vmem>>, %arg12: memref<16x1xf32, #tpu.memory_space<vmem>>) attributes {dimension_semantics = [#tpu.dimension_semantics<parallel>], iteration_bounds = array<i64: 1>, scalar_prefetch = 0 : i64, scratch_operands = 0 : i64, tpu.core_type = #tpu.core_type<tc>, window_params = [{transform_indices = @transform_0, window_bounds = array<i64: 16, 768>}, {pipeline_mode = #tpu.pipeline_mode<synchronous>, transform_indices = @transform_1, window_bounds = array<i64: 768, 128>}, {pipeline_mode = #tpu.pipeline_mode<synchronous>, transform_indices = @transform_2, window_bounds = array<i64: 1, 128>}, {pipeline_mode = #tpu.pipeline_mode<synchronous>, transform_indices = @transform_3, window_bounds = array<i64: 128, 64>}, {pipeline_mode = #tpu.pipeline_mode<synchronous>, transform_indices = @transform_4, window_bounds = array<i64: 1, 64>}, {pipeline_mode = #tpu.pipeline_mode<synchronous>, transform_indices = @transform_5, window_bounds = array<i64: 64, 128>}, {pipeline_mode = #tpu.pipeline_mode<synchronous>, transform_indices = @transform_6, window_bounds = array<i64: 1, 128>}, {transform_indices = @transform_7, window_bounds = array<i64: 16, 1>}, {pipeline_mode = #tpu.pipeline_mode<synchronous>, transform_indices = @transform_8, window_bounds = array<i64: 1, 128>}, {transform_indices = @transform_9, window_bounds = array<i64: 16, 128>}, {transform_indices = @transform_10, window_bounds = array<i64: 16, 1>}, {transform_indices = @transform_11, window_bounds = array<i64: 16, 1>}]} {
    %c0 = arith.constant 0 : index
    %c0_0 = arith.constant 0 : index
    %0 = vector.load %arg1[%c0, %c0_0] : memref<16x768xbf16, #tpu.memory_space<vmem>>, vector<16x768xbf16>
    %c0_1 = arith.constant 0 : index
    %c0_2 = arith.constant 0 : index
    %1 = vector.load %arg2[%c0_1, %c0_2] : memref<768x128xbf16, #tpu.memory_space<vmem>>, vector<768x128xbf16>
    %cst = arith.constant dense<0.000000e+00> : vector<16x128xf32>
    %2 = tpu.matmul %0, %1, %cst {dimension_numbers = #tpu.dot_dimension_numbers<[1], [0], [0], [1], [0, 0, 1, 1], [], []>} : vector<16x768xbf16>, vector<768x128xbf16>, vector<16x128xf32> -> vector<16x128xf32>
    %c0_3 = arith.constant 0 : index
    %c0_4 = arith.constant 0 : index
    %3 = vector.load %arg3[%c0_3, %c0_4] : memref<1x128xf32, #tpu.memory_space<vmem>>, vector<1x128xf32>
    %4 = vector.broadcast %3 : vector<1x128xf32> to vector<16x128xf32>
    %5 = arith.addf %2, %4 : vector<16x128xf32>
    %6 = math.tanh %5 : vector<16x128xf32>
    %7 = arith.truncf %6 : vector<16x128xf32> to vector<16x128xbf16>
    %c0_5 = arith.constant 0 : index
    %c0_6 = arith.constant 0 : index
    %8 = vector.load %arg4[%c0_5, %c0_6] : memref<128x64xbf16, #tpu.memory_space<vmem>>, vector<128x64xbf16>
    %cst_7 = arith.constant dense<0.000000e+00> : vector<16x64xf32>
    %9 = tpu.matmul %7, %8, %cst_7 {dimension_numbers = #tpu.dot_dimension_numbers<[1], [0], [0], [1], [0, 0, 1, 1], [], []>} : vector<16x128xbf16>, vector<128x64xbf16>, vector<16x64xf32> -> vector<16x64xf32>
    %c0_8 = arith.constant 0 : index
    %c0_9 = arith.constant 0 : index
    %10 = vector.load %arg5[%c0_8, %c0_9] : memref<1x64xf32, #tpu.memory_space<vmem>>, vector<1x64xf32>
    %11 = vector.broadcast %10 : vector<1x64xf32> to vector<16x64xf32>
    %12 = arith.addf %9, %11 : vector<16x64xf32>
    %13 = math.tanh %12 : vector<16x64xf32>
    %14 = arith.truncf %13 : vector<16x64xf32> to vector<16x64xbf16>
    %c0_10 = arith.constant 0 : index
    %c0_11 = arith.constant 0 : index
    %15 = vector.load %arg6[%c0_10, %c0_11] : memref<64x128xbf16, #tpu.memory_space<vmem>>, vector<64x128xbf16>
    %cst_12 = arith.constant dense<0.000000e+00> : vector<16x128xf32>
    %16 = tpu.matmul %14, %15, %cst_12 {dimension_numbers = #tpu.dot_dimension_numbers<[1], [0], [0], [1], [0, 0, 1, 1], [], []>} : vector<16x64xbf16>, vector<64x128xbf16>, vector<16x128xf32> -> vector<16x128xf32>
    %c0_13 = arith.constant 0 : index
    %c0_14 = arith.constant 0 : index
    %17 = vector.load %arg7[%c0_13, %c0_14] : memref<1x128xf32, #tpu.memory_space<vmem>>, vector<1x128xf32>
    %18 = vector.broadcast %17 : vector<1x128xf32> to vector<16x128xf32>
    %19 = arith.addf %16, %18 : vector<16x128xf32>
    %c0_15 = arith.constant 0 : index
    %c0_16 = arith.constant 0 : index
    %20 = vector.load %arg10[%c0_15, %c0_16] : memref<16x128xf32, #tpu.memory_space<vmem>>, vector<16x128xf32>
    tpu.vector_store %arg10[%c0_15, %c0_16], %19 {strides = array<i32>} : memref<16x128xf32, #tpu.memory_space<vmem>>, vector<16x128xf32>,
    %c0_17 = arith.constant 0 : index
    %c0_18 = arith.constant 0 : index
    %21 = vector.load %arg8[%c0_17, %c0_18] : memref<16x1xi32, #tpu.memory_space<vmem>>, vector<16x1xi32>
    %22 = tpu.iota {dimensions = array<i32: 1>} : vector<16x128xi32>
    %23 = vector.broadcast %21 : vector<16x1xi32> to vector<16x128xi32>
    %24 = arith.cmpi eq, %22, %23 : vector<16x128xi32>
    %25 = arith.extui %24 : vector<16x128xi1> to vector<16x128xi32>
    %26 = arith.sitofp %25 : vector<16x128xi32> to vector<16x128xf32>
    %c6_i32 = arith.constant 6 : i32
    %27 = vector.broadcast %c6_i32 : i32 to vector<16x128xi32>
    %28 = arith.cmpi slt, %22, %27 : vector<16x128xi32>
    %cst_19 = arith.constant -1.000000e+30 : f32
    %29 = vector.broadcast %cst_19 : f32 to vector<16x128xf32>
    %30 = arith.select %28, %19, %29 : vector<16x128xi1>, vector<16x128xf32>
    %cst_20 = arith.constant dense<0xFF800000> : vector<16xf32>
    %31 = vector.multi_reduction <maximumf>, %30, %cst_20 [1] : vector<16x128xf32> to vector<16xf32>
    %32 = vector.shape_cast %31 : vector<16xf32> to vector<16x1xf32>
    %33 = vector.broadcast %32 : vector<16x1xf32> to vector<16x128xf32>
    %34 = arith.subf %30, %33 : vector<16x128xf32>
    %35 = math.exp %34 : vector<16x128xf32>
    %cst_21 = arith.constant dense<0.000000e+00> : vector<16xf32>
    %36 = vector.multi_reduction <add>, %35, %cst_21 [1] : vector<16x128xf32> to vector<16xf32>
    %37 = vector.shape_cast %36 : vector<16xf32> to vector<16x1xf32>
    %38 = math.log %37 : vector<16x1xf32>
    %39 = arith.addf %32, %38 : vector<16x1xf32>
    %40 = arith.mulf %19, %26 : vector<16x128xf32>
    %cst_22 = arith.constant dense<0.000000e+00> : vector<16xf32>
    %41 = vector.multi_reduction <add>, %40, %cst_22 [1] : vector<16x128xf32> to vector<16xf32>
    %42 = vector.shape_cast %41 : vector<16xf32> to vector<16x1xf32>
    %43 = arith.subf %39, %42 : vector<16x1xf32>
    %c-100_i32 = arith.constant -100 : i32
    %44 = vector.broadcast %c-100_i32 : i32 to vector<16x1xi32>
    %45 = arith.cmpi ne, %21, %44 : vector<16x1xi32>
    %46 = arith.extui %45 : vector<16x1xi1> to vector<16x1xi32>
    %47 = arith.sitofp %46 : vector<16x1xi32> to vector<16x1xf32>
    %c0_23 = arith.constant 0 : index
    %c0_24 = arith.constant 0 : index
    %48 = vector.load %arg9[%c0_23, %c0_24] : memref<1x128xf32, #tpu.memory_space<vmem>>, vector<1x128xf32>
    %49 = vector.broadcast %48 : vector<1x128xf32> to vector<16x128xf32>
    %50 = arith.mulf %49, %26 : vector<16x128xf32>
    %cst_25 = arith.constant dense<0.000000e+00> : vector<16xf32>
    %51 = vector.multi_reduction <add>, %50, %cst_25 [1] : vector<16x128xf32> to vector<16xf32>
    %52 = vector.shape_cast %51 : vector<16xf32> to vector<16x1xf32>
    %53 = arith.mulf %47, %52 : vector<16x1xf32>
    %54 = arith.mulf %53, %43 : vector<16x1xf32>
    %c0_26 = arith.constant 0 : index
    %c0_27 = arith.constant 0 : index
    %55 = vector.load %arg11[%c0_26, %c0_27] : memref<16x1xf32, #tpu.memory_space<vmem>>, vector<16x1xf32>
    tpu.vector_store %arg11[%c0_26, %c0_27], %54 {strides = array<i32>} : memref<16x1xf32, #tpu.memory_space<vmem>>, vector<16x1xf32>,
    %c0_28 = arith.constant 0 : index
    %c0_29 = arith.constant 0 : index
    %56 = vector.load %arg12[%c0_28, %c0_29] : memref<16x1xf32, #tpu.memory_space<vmem>>, vector<16x1xf32>
    tpu.vector_store %arg12[%c0_28, %c0_29], %53 {strides = array<i32>} : memref<16x1xf32, #tpu.memory_space<vmem>>, vector<16x1xf32>,
    return
  }
  func.func @transform_0(%arg0: i32) -> (i32, i32) {
    %c0_i32 = arith.constant 0 : i32
    %c0_i32_0 = arith.constant 0 : i32
    return %arg0, %c0_i32 : i32, i32
  }
  func.func @transform_1(%arg0: i32) -> (i32, i32) {
    %c0_i32 = arith.constant 0 : i32
    %c0_i32_0 = arith.constant 0 : i32
    %c0_i32_1 = arith.constant 0 : i32
    return %c0_i32, %c0_i32_0 : i32, i32
  }
  func.func @transform_2(%arg0: i32) -> (i32, i32) {
    %c0_i32 = arith.constant 0 : i32
    %c0_i32_0 = arith.constant 0 : i32
    %c0_i32_1 = arith.constant 0 : i32
    return %c0_i32, %c0_i32_0 : i32, i32
  }
  func.func @transform_3(%arg0: i32) -> (i32, i32) {
    %c0_i32 = arith.constant 0 : i32
    %c0_i32_0 = arith.constant 0 : i32
    %c0_i32_1 = arith.constant 0 : i32
    return %c0_i32, %c0_i32_0 : i32, i32
  }
  func.func @transform_4(%arg0: i32) -> (i32, i32) {
    %c0_i32 = arith.constant 0 : i32
    %c0_i32_0 = arith.constant 0 : i32
    %c0_i32_1 = arith.constant 0 : i32
    return %c0_i32, %c0_i32_0 : i32, i32
  }
  func.func @transform_5(%arg0: i32) -> (i32, i32) {
    %c0_i32 = arith.constant 0 : i32
    %c0_i32_0 = arith.constant 0 : i32
    %c0_i32_1 = arith.constant 0 : i32
    return %c0_i32, %c0_i32_0 : i32, i32
  }
  func.func @transform_6(%arg0: i32) -> (i32, i32) {
    %c0_i32 = arith.constant 0 : i32
    %c0_i32_0 = arith.constant 0 : i32
    %c0_i32_1 = arith.constant 0 : i32
    return %c0_i32, %c0_i32_0 : i32, i32
  }
  func.func @transform_7(%arg0: i32) -> (i32, i32) {
    %c0_i32 = arith.constant 0 : i32
    %c0_i32_0 = arith.constant 0 : i32
    return %arg0, %c0_i32 : i32, i32
  }
  func.func @transform_8(%arg0: i32) -> (i32, i32) {
    %c0_i32 = arith.constant 0 : i32
    %c0_i32_0 = arith.constant 0 : i32
    %c0_i32_1 = arith.constant 0 : i32
    return %c0_i32, %c0_i32_0 : i32, i32
  }
  func.func @transform_9(%arg0: i32) -> (i32, i32) {
    %c0_i32 = arith.constant 0 : i32
    %c0_i32_0 = arith.constant 0 : i32
    return %arg0, %c0_i32 : i32, i32
  }
  func.func @transform_10(%arg0: i32) -> (i32, i32) {
    %c0_i32 = arith.constant 0 : i32
    %c0_i32_0 = arith.constant 0 : i32
    return %arg0, %c0_i32 : i32, i32
  }
  func.func @transform_11(%arg0: i32) -> (i32, i32) {
    %c0_i32 = arith.constant 0 : i32
    %c0_i32_0 = arith.constant 0 : i32
    return %arg0, %c0_i32 : i32, i32
  }
}

</mosaic_0001>

<bundles_post_ra>
// kernel: bert_finetune_forward.1
= control target key start
LH: loop header
LB: loop body
LE: loop exit
PB: predicated region body
PF: predicated region fallthrough
CT: control target
= control target key end

     0   :  { %v1154_v54 = vmov 0.0   ;;  %vm1155_vm0 = vmmov 0   ;;  %vm743_vm1 = vcmask 523264   ;;  %vm860_vm7 = vcmask 7168   ;;  %s1481_s1 = inlined_call_operand.vmem [shape: bf16[768,128], index: 1, kind: input, shape index: {}]   ;;  %s1482_s0 = inlined_call_operand.vmem [shape: bf16[16,768], index: 0, kind: input, shape index: {}]   ;;  %s1483_s3 = inlined_call_operand.vmem [shape: bf16[128,64], index: 3, kind: input, shape index: {}]   ;;  %s1484_s2 = inlined_call_operand.vmem [shape: f32[1,128], index: 2, kind: input, shape index: {}]   ;;  %s1485_s5 = inlined_call_operand.vmem [shape: bf16[64,128], index: 5, kind: input, shape index: {}]   ;;  %s1486_s7 = inlined_call_operand.vmem [shape: s32[16,1], index: 7, kind: input, shape index: {}]   ;;  %s1487_s4 = inlined_call_operand.vmem [shape: f32[1,64], index: 4, kind: input, shape index: {}]   ;;  %s1488_s6 = inlined_call_operand.vmem [shape: f32[1,128], index: 6, kind: input, shape index: {}]   ;;  %s1489_s9 = inlined_call_operand.vmem [shape: f32[16,128], index: 9, kind: output, shape index: {0}]   ;;  %s1490_s8 = inlined_call_operand.vmem [shape: f32[1,128], index: 8, kind: input, shape index: {}]   ;;  %s1491_s11 = inlined_call_operand.vmem [shape: f32[16,1], index: 11, kind: output, shape index: {2}]   ;;  %s1492_s10 = inlined_call_operand.vmem [shape: f32[16,1], index: 10, kind: output, shape index: {1}]  }
   0x1   :  { %v1069_v0 = vld [vmem:[%s1481_s1 + $0x40] sm:$0xff]   ;;  %v1073_v4 = vld [vmem:[%s1481_s1 + $0x48] sm:$0xff]   ;;  %v1077_v8 = vld [vmem:[%s1481_s1 + $0x50] sm:$0xff]  }
   0x2   :  { %v1070_v1 = vld [vmem:[%s1481_s1] sm:$0xff]   ;;  %952 = vmatprep.subr.bf16.mxu0 %v1069_v0  ;;  %v1074_v5 = vld [vmem:[%s1481_s1 + $0x8] sm:$0xff]   ;;  %v1078_v9 = vld [vmem:[%s1481_s1 + $0x10] sm:$0xff]  }
   0x3   :  { %v1071_v2 = vld [vmem:[%s1481_s1 + $0xc0] sm:$0xff]   ;;  %953 = vmatpush3.bf16.msra.mxu0 %v1070_v1  ;;  %v1075_v6 = vld [vmem:[%s1481_s1 + $0xc8] sm:$0xff]   ;;  %v1079_v10 = vld [vmem:[%s1481_s1 + $0xd0] sm:$0xff]  }
   0x4   :  { %v1072_v3 = vld [vmem:[%s1481_s1 + $0x80] sm:$0xff]   ;;  %974 = vmatprep.subr.bf16.mxu1 %v1071_v2  ;;  %954 = vmatprep.subr.bf16.mxu0 %v1073_v4  ;;  %v1076_v7 = vld [vmem:[%s1481_s1 + $0x88] sm:$0xff]   ;;  %v1080_v11 = vld [vmem:[%s1481_s1 + $0x90] sm:$0xff]  }
   0x5   :  { %975 = vmatpush3.bf16.msra.mxu1 %v1072_v3  ;;  %v1081_v12 = vld [vmem:[%s1481_s1 + $0x58] sm:$0xff]   ;;  %v1085_v16 = vld [vmem:[%s1481_s1 + $0x60] sm:$0xff]   ;;  %v1089_v20 = vld [vmem:[%s1481_s1 + $0x68] sm:$0xff]  }
   0x6   :  { %976 = vmatprep.subr.bf16.mxu1 %v1075_v6  ;;  %v1082_v13 = vld [vmem:[%s1481_s1 + $0x18] sm:$0xff]   ;;  %v1086_v17 = vld [vmem:[%s1481_s1 + $0x20] sm:$0xff]   ;;  %v1090_v21 = vld [vmem:[%s1481_s1 + $0x28] sm:$0xff]  }
   0x7   :  { %955 = vmatpush3.bf16.msra.mxu0 %v1074_v5  ;;  %v1083_v14 = vld [vmem:[%s1481_s1 + $0xd8] sm:$0xff]   ;;  %v1087_v18 = vld [vmem:[%s1481_s1 + $0xe0] sm:$0xff]   ;;  %v1091_v22 = vld [vmem:[%s1481_s1 + $0xe8] sm:$0xff]  }
   0x8   :  { %956 = vmatprep.subr.bf16.mxu0 %v1077_v8  ;;  %v1084_v15 = vld [vmem:[%s1481_s1 + $0x98] sm:$0xff]   ;;  %v1088_v19 = vld [vmem:[%s1481_s1 + $0xa0] sm:$0xff]   ;;  %v1092_v23 = vld [vmem:[%s1481_s1 + $0xa8] sm:$0xff]  }
   0x9   :  { %977 = vmatpush3.bf16.msra.mxu1 %v1076_v7  ;;  %v1093_v24 = vld [vmem:[%s1481_s1 + $0x70] sm:$0xff]   ;;  %v1097_v28 = vld [vmem:[%s1481_s1 + $0x78] sm:$0xff]   ;;  %v1104_v34 = vld [vmem:[%s1481_s1 + $0x140] sm:$0xff]  }
   0xa   :  { %978 = vmatprep.subr.bf16.mxu1 %v1079_v10  ;;  %v1094_v25 = vld [vmem:[%s1481_s1 + $0x30] sm:$0xff]   ;;  %v1098_v29 = vld [vmem:[%s1481_s1 + $0x38] sm:$0xff]   ;;  %v1105_v35 = vld [vmem:[%s1482_s0 + $0x8] ss:$24 sps:$4 sm:$0xff]  }
   0xb   :  { %957 = vmatpush3.bf16.msra.mxu0 %v1078_v9  ;;  %v1095_v26 = vld [vmem:[%s1481_s1 + $0xf0] sm:$0xff]   ;;  %v1099_v30 = vld [vmem:[%s1481_s1 + $0xf8] sm:$0xff]   ;;  %v1107_v36 = vld [vmem:[%s1482_s0 + $0xc] ss:$24 sps:$4 sm:$0xff]  }
   0xc   :  { %958 = vmatprep.subr.bf16.mxu0 %v1081_v12  ;;  %v1096_v27 = vld [vmem:[%s1481_s1 + $0xb0] sm:$0xff]   ;;  %v1100_v31 = vld [vmem:[%s1482_s0] ss:$24 sps:$4 sm:$0xff]   ;;  %v1102_v32 = vld [vmem:[%s1482_s0 + $0x4] ss:$24 sps:$4 sm:$0xff]   ;;  %536 = vmatprep.mubr.bf16.mxu1 %v1107_v36 }
   0xd   :  { %979 = vmatpush3.bf16.msra.mxu1 %v1080_v11  ;;  %v1103_v33 = vld [vmem:[%s1481_s1 + $0xb8] sm:$0xff]   ;;  %495 = vmatprep.mubr.bf16.mxu0 %v1102_v32  ;;  %v1108_v37 = vld [vmem:[%s1481_s1 + $0x100] sm:$0xff]   ;;  %v1109_v38 = vld [vmem:[%s1481_s1 + $0x148] sm:$0xff]  }
   0xe   :  { %980 = vmatprep.subr.bf16.mxu1 %v1083_v14  ;;  %v1110_v39 = vld [vmem:[%s1481_s1 + $0x108] sm:$0xff]   ;;  %v1111_v40 = vld [vmem:[%s1481_s1 + $0x150] sm:$0xff]   ;;  %v1113_v42 = vld [vmem:[%s1481_s1 + $0x158] sm:$0xff]  }
   0xf   :  { %959 = vmatpush3.bf16.msra.mxu0 %v1082_v13  ;;  %v1112_v41 = vld [vmem:[%s1481_s1 + $0x110] sm:$0xff]   ;;  %v1114_v43 = vld [vmem:[%s1481_s1 + $0x118] sm:$0xff]   ;;  %v1115_v44 = vld [vmem:[%s1481_s1 + $0x160] sm:$0xff]  }
  0x10   :  { %960 = vmatprep.subr.bf16.mxu0 %v1085_v16  ;;  %v1116_v45 = vld [vmem:[%s1481_s1 + $0x120] sm:$0xff]   ;;  %v1117_v46 = vld [vmem:[%s1481_s1 + $0x168] sm:$0xff]   ;;  %v1119_v49 = vld [vmem:[%s1481_s1 + $0x170] sm:$0xff]  }
  0x11   :  { %981 = vmatpush3.bf16.msra.mxu1 %v1084_v15  ;;  %v1125_v47 = vld [vmem:[%s1482_s0 + $0x14] ss:$24 sps:$4 sm:$0xff]   ;;  %v1121_v51 = vld [vmem:[%s1481_s1 + $0x178] sm:$0xff]   ;;  %v1123_v53 = vld [vmem:[%s1482_s0 + $0x10] ss:$24 sps:$4 sm:$0xff]  }
  0x12   :  { %982 = vmatprep.subr.bf16.mxu1 %v1087_v18  ;;  %v1118_v48 = vld [vmem:[%s1481_s1 + $0x128] sm:$0xff]   ;;  %v1120_v50 = vld [vmem:[%s1481_s1 + $0x130] sm:$0xff]   ;;  %v1122_v52 = vld [vmem:[%s1481_s1 + $0x138] sm:$0xff]  }
  0x13   :  { %961 = vmatpush3.bf16.msra.mxu0 %v1086_v17  ;;  %v1126_v55 = vld [vmem:[%s1483_s3] sm:$0xff]   ;;  %v1127_v56 = vld [vmem:[%s1483_s3 + $0x8] sm:$0xff]   ;;  %v1128_v57 = vld [vmem:[%s1483_s3 + $0x10] sm:$0xff]  }
  0x14   :  { %962 = vmatprep.subr.bf16.mxu0 %v1089_v20  ;;  %v1129_v58 = vld [vmem:[%s1483_s3 + $0x18] sm:$0xff]   ;;  %v1130_v59 = vld [vmem:[%s1483_s3 + $0x20] sm:$0xff]   ;;  %v1131_v60 = vld [vmem:[%s1483_s3 + $0x28] sm:$0xff]  }
  0x15   :  { %983 = vmatpush3.bf16.msra.mxu1 %v1088_v19  ;;  %v1132_v61 = vld [vmem:[%s1483_s3 + $0x30] sm:$0xff]   ;;  %v1133_v62 = vld [vmem:[%s1483_s3 + $0x38] sm:$0xff]   ;;  %v877_v0 = vld [vmem:[%s1484_s2] ss:$0 sm:$0xff] }
  0x16   :  { %984 = vmatprep.subr.bf16.mxu1 %v1091_v22  ;;  %v1435_v32 = vld [vmem:[%s1486_s7] sm:$0xff] }
  0x17   :  { %963 = vmatpush3.bf16.msra.mxu0 %v1090_v21  ;;  %vm837_vm5 = vcmp.ne.s32.totalorder %v1435_v32, 4294967196 }
  0x18   :  { %964 = vmatprep.subr.bf16.mxu0 %v1093_v24 }
  0x19   :  { %985 = vmatpush3.bf16.msra.mxu1 %v1092_v23 }
  0x1a   :  { %986 = vmatprep.subr.bf16.mxu1 %v1095_v26 }
  0x1b   :  { %965 = vmatpush3.bf16.msra.mxu0 %v1094_v25 }
  0x1c   :  { %966 = vmatprep.subr.bf16.mxu0 %v1097_v28  ;;  %v1135_v28 = vld [vmem:[%s1485_s5 + $0x8] sm:$0xff]  }
  0x1d   :  { %987 = vmatpush3.bf16.msra.mxu1 %v1096_v27  ;;  %v1134_v27 = vld [vmem:[%s1485_s5] sm:$0xff]  }
  0x1e   :  { %988 = vmatprep.subr.bf16.mxu1 %v1099_v30  ;;  %v1137_v30 = vld [vmem:[%s1485_s5 + $0x18] sm:$0xff]  }
  0x1f   :  { %967 = vmatpush3.bf16.msra.mxu0 %v1098_v29  ;;  %v1136_v29 = vld [vmem:[%s1485_s5 + $0x10] sm:$0xff]  }
  0x20   :  { %996 = vmatprep.subr.bf16.mxu0 %v1104_v34  ;;  %v932_v34 = vld [vmem:[%s1487_s4] ss:$0 sm:$0xff] }
  0x21   :  { %989 = vmatpush3.bf16.msra.mxu1 %v1103_v33  ;;  %v1441_v33 = vld [vmem:[%s1486_s7 + $0x8] sm:$0xff] }
  0x22   :  { %496 = vmatmul.mubr.bf16.vlgmr.msra.gmra.mrb[0].mxu0 %v1100_v31  ;;  %1032 = vmatprep.subr.bf16.mxu1 %v1154_v54  ;;  %v1156_v31 = vmov 0   ;;  %vm838_vm6 = vcmp.ne.s32.totalorder %v1441_v33, 4294967196 }
  0x23   :  { %997 = vmatpush3.bf16.msra.mxu0 %v1108_v37  ;;  %577 = vmatprep.mubr.bf16.mxu0 %v1125_v47 }
  0x24   :  { %537 = vmatmul.mubr.bf16.vlgmr.msra.gmra.mrb[0].mxu1 %v1105_v35  ;;  %998 = vmatprep.subr.bf16.mxu0 %v1109_v38 }
  0x25   :  { %1033 = vmatpush3.bf16.msra.mxu1 %v1126_v55  ;;  %1048 = vmatprep.mubr.msk.bf16.mxu1 %vm1155_vm0, %v1154_v54 }
  0x26   :  { %1034 = vmatprep.subr.bf16.mxu1 %v1154_v54  ;;  %1067 = vset.pattern.permute.xlu1 %v1156_v31 }
  0x27   :  { %999 = vmatpush3.bf16.msra.mxu0 %v1110_v39  ;;  %1068 = vset.pattern.permute.xlu0 %v1156_v31 }
  0x28   :  { %1000 = vmatprep.subr.bf16.mxu0 %v1111_v40  ;;  %795 = vperm.xlu1 %1067, %v1435_v32  }
  0x29   :  { %1035 = vmatpush3.bf16.msra.mxu1 %v1127_v56 }
  0x2a   :  { %1036 = vmatprep.subr.bf16.mxu1 %v1154_v54 }
  0x2b   :  { %1001 = vmatpush3.bf16.msra.mxu0 %v1112_v41 }
  0x2c   :  { %1002 = vmatprep.subr.bf16.mxu0 %v1113_v42  ;;  %798 = vperm.xlu1 %1067, %v1441_v33  }
  0x2d   :  { %1037 = vmatpush3.bf16.msra.mxu1 %v1128_v57 }
  0x2e   :  { %1038 = vmatprep.subr.bf16.mxu1 %v1154_v54 }
  0x2f   :  { %1003 = vmatpush3.bf16.msra.mxu0 %v1114_v43 }
  0x30   :  { %1004 = vmatprep.subr.bf16.mxu0 %v1115_v44  ;;  %v792_v44 = vlaneseq }
  0x31   :  { %1039 = vmatpush3.bf16.msra.mxu1 %v1129_v58 }
  0x32   :  { %1040 = vmatprep.subr.bf16.mxu1 %v1154_v54 }
  0x33   :  { %1005 = vmatpush3.bf16.msra.mxu0 %v1116_v45  ;;  %v793_v45 = vand.u32 127, %v792_v44 }
  0x34   :  { %1006 = vmatprep.subr.bf16.mxu0 %v1117_v46  ;;  %v941_v46 = vld [vmem:[%s1488_s6] ss:$0 sm:$0xff] }
  0x35   :  { %1041 = vmatpush3.bf16.msra.mxu1 %v1130_v59  ;;  %vm806_vm2 = vcmp.lt.s32.totalorder %v793_v45, 6 }
  0x36   :  { %1042 = vmatprep.subr.bf16.mxu1 %v1154_v54 }
  0x37   :  { %1007 = vmatpush3.bf16.msra.mxu0 %v1118_v48 }
  0x38   :  { %1008 = vmatprep.subr.bf16.mxu0 %v1119_v49 }
  0x39   :  { %1043 = vmatpush3.bf16.msra.mxu1 %v1131_v60 }
  0x3a   :  { %1044 = vmatprep.subr.bf16.mxu1 %v1154_v54 }
  0x3b   :  { %1009 = vmatpush3.bf16.msra.mxu0 %v1120_v50 }
  0x3c   :  { %1010 = vmatprep.subr.bf16.mxu0 %v1121_v51 }
  0x3d   :  { %1045 = vmatpush3.bf16.msra.mxu1 %v1132_v61 }
  0x3e   :  { %1046 = vmatprep.subr.bf16.mxu1 %v1154_v54 }
  0x3f   :  { %1011 = vmatpush3.bf16.msra.mxu0 %v1122_v52 }
  0x40   :  { %1052 = vmatprep.subr.bf16.mxu0 %v1154_v54 }
  0x41   :  { %1047 = vmatpush3.bf16.msra.mxu1 %v1133_v62 }
  0x42   :  { %578 = vmatmul.mubr.bf16.vlgmr.msra.gmra.mrb[4].mxu0 %v1123_v53 }
  0x43   :  { %1060 = vmatprep.mubr.msk.bf16.mxu0 %vm1155_vm0, %v1154_v54  ;;  %1053 = vmatpush3.bf16.msra.mxu0 %v1134_v27 }
  0x44   :  { %1054 = vmatprep.subr.bf16.mxu0 %v1154_v54 }
  0x47   :  { %1055 = vmatpush3.bf16.msra.mxu0 %v1135_v28 }
  0x48   :  { %1056 = vmatprep.subr.bf16.mxu0 %v1154_v54 }
  0x4b   :  { %1057 = vmatpush3.bf16.msra.mxu0 %v1136_v29 }
  0x4c   :  { %1058 = vmatprep.subr.bf16.mxu0 %v1154_v54 }
  0x4f   :  { %1059 = vmatpush3.bf16.msra.mxu0 %v1137_v30 }
  0xa7   :  { %v796_v61 = vpop.permute.xlu1 %795 }
  0xa8   :  { %vm800_vm3 = vcmp.eq.s32.totalorder %v793_v45, %v796_v61 }
  0xf5   :  { %v968_v63 = vpop.f32.mrb[0].mxu0 }
  0xf6   :  { %v969_v1 = vpop.f32.mrb[1].mxu0 }
  0xf7   :  { %v970_v2 = vadd.f32 %v969_v1, %v968_v63  ;;  %v971_v3 = vpop.f32.mrb[2].mxu0  ;;  %v990_v4 = vpop.f32.mrb[0].mxu1  ;;  %v947_v1 = vsel %vm800_vm3, 1.0, %v1154_v54 }
  0xf8   :  { %v972_v5 = vpop.f32.mrb[3].mxu0  ;;  %v991_v8 = vpop.f32.mrb[1].mxu1 }
  0xf9   :  { %v498_v6 = vadd.f32 %v970_v2, %v877_v0  ;;  %v973_v7 = vadd.f32 %v972_v5, %v971_v3  ;;  %v992_v9 = vadd.f32 %v991_v8, %v990_v4  ;;  %v993_v10 = vpop.f32.mrb[2].mxu1  ;;  %v799_v63 = vpop.permute.xlu1 %798 }
  0xfa   :  { %v994_v12 = vpop.f32.mrb[3].mxu1  ;;  %vm801_vm4 = vcmp.eq.s32.totalorder %v793_v45, %v799_v63 }
  0xfb   :  { %v501_v11 = vadd.f32 %v973_v7, %v877_v0  ;;  %v539_v13 = vadd.f32 %v992_v9, %v498_v6  ;;  %v995_v14 = vadd.f32 %v994_v12, %v993_v10  ;;  %v948_v4 = vsel %vm801_vm4, 1.0, %v1154_v54  ;;  %v951_v6 = vld [vmem:[%s1490_s8] ss:$0 sm:$0xff] }
  0xfc   :  { %v850_v7 = vmul.f32 %v951_v6, %v947_v1  ;;  %v851_v8 = vmul.f32 %v951_v6, %v948_v4 }
  0xfd   :  { %v542_v15 = vadd.f32 %v995_v14, %v501_v11 }
 0x115   :  { %v1012_v16 = vpop.f32.mrb[4].mxu0 }
 0x116   :  { %v1013_v17 = vpop.f32.mrb[5].mxu0 }
 0x117   :  { %v1014_v18 = vadd.f32 %v1013_v17, %v1012_v16  ;;  %v1015_v19 = vpop.f32.mrb[6].mxu0 }
 0x118   :  { %v1016_v20 = vpop.f32.mrb[7].mxu0 }
 0x119   :  { %v580_v21 = vadd.f32 %v1014_v18, %v539_v13  ;;  %v1017_v22 = vadd.f32 %v1016_v20, %v1015_v19  ;;  %v949_v13 = vsel %vm837_vm5, 1.0, %v1154_v54  ;;  %v950_v19 = vsel %vm838_vm6, 1.0, %v1154_v54 }
 0x11b   :  { %v583_v23 = vadd.f32 %v1017_v22, %v542_v15  ;;  %1138 = vtanh.f32 %v580_v21 }
 0x11d   :  { %1140 = vtanh.f32 %v583_v23 }
 0x125   :  { %v1139_v24 = vpop.eup %1138 }
 0x127   :  { %v1141_v25 = vpop.eup %1140 }
 0x128   :  { %v588_v26 = vpack.c.bf16 %v1141_v25, %v1139_v24 }
 0x12a   :  { %1049 = vmatmul.mubr.bf16.vlgmr.msra.gmra.mrb[4].mxu1 %v588_v26 }
 0x1fd   :  { %v694_v35 = vpop.f32.mrb[4].mxu1 }
 0x1fe   :  { %v695_v36 = vadd.f32 %v932_v34, %v694_v35  ;;  %v1050_v37 = vpop.f32.mrb[5].mxu1 }
 0x1ff   :  { %v697_v38 = vpop.f32.mrb[6].mxu1 }
 0x200   :  { %v698_v39 = vadd.f32 %v932_v34, %v697_v38  ;;  %v1051_v40 = vpop.f32.mrb[7].mxu1  ;;  %1142 = vtanh.f32 %v695_v36 }
 0x202   :  { %1144 = vtanh.f32 %v698_v39 }
 0x20a   :  { %v1143_v41 = vpop.eup %1142 }
 0x20c   :  { %v1145_v42 = vpop.eup %1144 }
 0x20d   :  { %v703_v43 = vpack.c.bf16 %v1145_v42, %v1143_v41 }
 0x20f   :  { %1061 = vmatmul.mubr.msk.bf16.vlgmr.msra.gmra.mrb[8].mxu0 %vm743_vm1, %v703_v43 }
 0x2e2   :  { %v781_v47 = vpop.f32.mrb[8].mxu0 }
 0x2e3   :  { %v782_v48 = vadd.f32 %v941_v46, %v781_v47  ;;  %v1062_v49 = vpop.f32.mrb[9].mxu0 }
 0x2e4   :  { %v784_v50 = vpop.f32.mrb[10].mxu0 }
 0x2e5   :  { %788 = vst [vmem:[%s1489_s9] sm:$0xff] %v782_v48  ;;  %v785_v51 = vadd.f32 %v941_v46, %v784_v50  ;;  %v1063_v52 = vpop.f32.mrb[11].mxu0  ;;  %v807_v53 = vsel %vm806_vm2, %v782_v48, -1e+30  ;;  %v829_v2 = vmul.f32 %v947_v1, %v782_v48 }
 0x2e6   :  { %809 = vmax.xlane.f32.xlu0 %v807_v53 }
 0x2e7   :  { %789 = vst [vmem:[%s1489_s9 + $0x8] sm:$0xff] %v785_v51  ;;  %v808_v55 = vsel %vm806_vm2, %v785_v51, -1e+30  ;;  %v830_v5 = vmul.f32 %v948_v4, %v785_v51 }
 0x2ea   :  { %811 = vmax.xlane.f32.xlu0 %v808_v55 }
 0x373   :  { %v810_v56 = vpop.xlane.xlu0 %809 }
 0x374   :  { %v813_v57 = vsub.f32 %v807_v53, %v810_v56 }
 0x376   :  { %v815_v58 = vmul.f32 1.442695, %v813_v57 }
 0x377   :  { %v812_v59 = vpop.xlane.xlu0 %811 }
 0x378   :  { %1146 = vpow2.f32 %v815_v58  ;;  %v814_v60 = vsub.f32 %v808_v55, %v812_v59 }
 0x37a   :  { %v817_v62 = vmul.f32 1.442695, %v814_v60 }
 0x37c   :  { %1148 = vpow2.f32 %v817_v62 }
 0x382   :  { %v1147_v0 = vpop.eup %1146 }
 0x383   :  { %819 = vadd.xlane.f32.xlu0 %v1147_v0 }
 0x386   :  { %v1149_v3 = vpop.eup %1148 }
 0x387   :  { %831 = vadd.xlane.f32.xlu0 %v829_v2  ;;  %821 = vadd.xlane.f32.xlu1 %v1149_v3 }
 0x38b   :  { %833 = vadd.xlane.f32.xlu0 %v830_v5 }
 0x38f   :  { %852 = vadd.xlane.f32.xlu0 %v850_v7 }
 0x393   :  { %854 = vadd.xlane.f32.xlu0 %v851_v8 }
 0x410   :  { %v820_v9 = vpop.xlane.xlu0 %819 }
 0x411   :  { %1150 = vlog2.f32 %v820_v9 }
 0x414   :  { %v822_v10 = vpop.xlane.xlu1 %821  ;;  %v832_v11 = vpop.xlane.xlu0 %831 }
 0x415   :  { %1152 = vlog2.f32 %v822_v10 }
 0x418   :  { %v834_v12 = vpop.xlane.xlu0 %833 }
 0x41b   :  { %v1151_v14 = vpop.eup %1150 }
 0x41c   :  { %v824_v15 = vmul.f32 0.6931472, %v1151_v14  ;;  %v853_v16 = vpop.xlane.xlu0 %852 }
 0x41d   :  { %v856_v17 = vmul.f32 %v949_v13, %v853_v16 }
 0x41e   :  { %v827_v18 = vadd.f32 %v824_v15, %v810_v56 }
 0x41f   :  { %v1153_v20 = vpop.eup %1152  ;;  %863 = vst.msk [vmem:[%s1491_s11] sm:$0xff] %vm860_vm7, %v856_v17 }
 0x420   :  { %v826_v21 = vmul.f32 0.6931472, %v1153_v20  ;;  %v835_v22 = vsub.f32 %v827_v18, %v832_v11  ;;  %v855_v23 = vpop.xlane.xlu0 %854 }
 0x421   :  { %v857_v24 = vmul.f32 %v950_v19, %v855_v23 }
 0x422   :  { %v828_v25 = vadd.f32 %v826_v21, %v812_v59  ;;  %v858_v26 = vmul.f32 %v856_v17, %v835_v22 }
 0x423   :  { %864 = vst.msk [vmem:[%s1491_s11 + $0x8] sm:$0xff] %vm860_vm7, %v857_v24 }
 0x424   :  { %v836_v27 = vsub.f32 %v828_v25, %v834_v12  ;;  %861 = vst.msk [vmem:[%s1492_s10] sm:$0xff] %vm860_vm7, %v858_v26 }
 0x426   :  { %v859_v54 = vmul.f32 %v857_v24, %v836_v27 }
 0x428   :  { %862 = vst.msk [vmem:[%s1492_s10 + $0x8] sm:$0xff] %vm860_vm7, %v859_v54 }

</bundles_post_ra>
